<compile_context>
chip_gen: v5e
topology: v5e:2x2
jax: 0.10.0
libtpu: 0.0.40
codegen_flags: <defaults>
</compile_context>

<pallas_src>
import functools

import jax
import jax.numpy as jnp
from jax.experimental import pallas as pl
from jax.experimental.pallas import tpu as pltpu

LANE = 128
SUBLANE = 8
_MiB = 1024 * 1024


def _round_up(v, m):
    return (v + m - 1) // m * m


def _nbytes(a):
    return int(a.size) * jnp.dtype(a.dtype).itemsize


def _pick_tile(n, target, align):
    """Largest multiple of `align` that divides n and is <= target.
    Falls back to n itself (a full-dim block is always legal)."""
    t = min(target, n)
    t -= t % align
    while t > 0:
        if n % t == 0:
            return t
        t -= align
    return n  # TODO(synk): ragged N would need masked edge tiles instead.


def _mosaic_params(vmem_est_bytes, dims=None):
    # Default scoped VMEM (16 MiB v5e / 32 MiB v6e,v7x) is far below physical;
    # request what we actually need (2x headroom), capped at 64 MiB so the
    # same plan also fits v7x's 64 MiB physical VMEM.
    limit = int(min(max(2 * vmem_est_bytes, 32 * _MiB), 64 * _MiB))
    kwargs = dict(vmem_limit_bytes=limit)
    if dims is not None:
        kwargs["dimension_semantics"] = dims
    return pltpu.CompilerParams(**kwargs)


# --------------------------------------------------------------------------
# Kernels
# --------------------------------------------------------------------------
def _gcn_fused_kernel(adj_ref, x_ref, w1_ref, b1_ref, w2_ref, b2_ref, *rest,
                      compute_dtype, has_mask):
    """out = adj @ (dropout(relu(adj @ (x@W1) + b1)) @ W2) + b2, all in VMEM."""
    if has_mask:
        mask_ref, o_ref = rest
    else:
        (o_ref,) = rest
    cd = compute_dtype
    # adj arrives in the caller's dtype (typically f32) and is cast AFTER the
    # VMEM load -- no wrapper-side N^2 HBM cast pass.
    adj = adj_ref[...].astype(cd)

    # layer 1: h = relu(adj @ (x @ W1) + b1)   (MXU, f32 accumulate)
    s1 = jnp.dot(x_ref[...], w1_ref[...], preferred_element_type=jnp.float32)
    h = jnp.dot(adj, s1.astype(cd), preferred_element_type=jnp.float32)
    h = jnp.maximum(h + b1_ref[...], 0.0)

    # dropout: precomputed {0, 1/keep_prob} scale mask (training only).
    # TODO(synk): on-device pltpu.prng_seed/prng_random_bits would avoid the
    # mask input, but those primitives do not lower on CPU/interpret.
    if has_mask:
        h = h * mask_ref[...]

    # layer 2: out = adj @ (h @ W2) + b2
    s2 = jnp.dot(h.astype(cd), w2_ref[...], preferred_element_type=jnp.float32)
    out = jnp.dot(adj, s2.astype(cd), preferred_element_type=jnp.float32)
    o_ref[...] = (out + b2_ref[...]).astype(o_ref.dtype)


def _feat_kernel(x_ref, w_ref, o_ref):
    """support = x @ W (row-tiled, lane-dense)."""
    o_ref[...] = jnp.dot(x_ref[...], w_ref[...],
                         preferred_element_type=jnp.float32).astype(o_ref.dtype)


def _agg_kernel(adj_ref, s_ref, b_ref, *rest, compute_dtype, relu, has_mask):
    """acc += adj_tile @ support_tile; finalize: act(acc + b) [* dropout mask]."""
    if has_mask:
        mask_ref, o_ref, acc_ref = rest
    else:
        o_ref, acc_ref = rest
    k = pl.program_id(1)

    @pl.when(k == 0)
    def _init():
        acc_ref[...] = jnp.zeros_like(acc_ref)

    adj = adj_ref[...].astype(compute_dtype)   # cast after the VMEM load
    acc_ref[...] += jnp.dot(adj, s_ref[...], preferred_element_type=jnp.float32)

    @pl.when(k == pl.num_programs(1) - 1)
    def _finalize():
        out = acc_ref[...] + b_ref[...]
        if relu:
            out = jnp.maximum(out, 0.0)
        if has_mask:
            out = out * mask_ref[...]
        o_ref[...] = out.astype(o_ref.dtype)


# --------------------------------------------------------------------------
# Wrappers
# --------------------------------------------------------------------------
def _feat_transform(x_p, w_p, out_dtype, row_tile):
    n, fp = x_p.shape
    hp = w_p.shape[1]
    tr = _pick_tile(n, row_tile, SUBLANE)
    grid = (n // tr,)
    out_item = jnp.dtype(out_dtype).itemsize
    vmem_est = 2 * (tr * fp * jnp.dtype(x_p.dtype).itemsize
                    + fp * hp * jnp.dtype(w_p.dtype).itemsize
                    + tr * hp * out_item)
    cost = pl.CostEstimate(
        flops=2 * n * fp * hp, transcendentals=0,
        bytes_accessed=_nbytes(x_p) + grid[0] * _nbytes(w_p) + n * hp * out_item)
    return pl.pallas_call(
        _feat_kernel,
        out_shape=jax.ShapeDtypeStruct((n, hp), out_dtype),
        grid=grid,
        in_specs=[pl.BlockSpec((tr, fp), lambda r: (r, 0)),
                  pl.BlockSpec((fp, hp), lambda r: (0, 0))],
        out_specs=pl.BlockSpec((tr, hp), lambda r: (r, 0)),
        compiler_params=_mosaic_params(vmem_est, dims=("parallel",)),
        cost_estimate=cost,
    )(x_p, w_p)


def _aggregate(adj, support, bias, *, relu, mask, out_dtype, compute_dtype,
               row_tile, k_tile):
    n = adj.shape[0]
    hp = support.shape[1]
    tr = _pick_tile(n, row_tile, SUBLANE)
    tk = _pick_tile(n, k_tile, LANE)
    grid = (n // tr, n // tk)

    in_specs = [
        pl.BlockSpec((tr, tk), lambda r, k: (r, k)),    # adj tile (streamed once)
        pl.BlockSpec((tk, hp), lambda r, k: (k, 0)),    # resident support slab
        pl.BlockSpec((1, hp), lambda r, k: (0, 0)),     # bias
    ]
    args = [adj, support, bias]
    if mask is not None:
        in_specs.append(pl.BlockSpec((tr, hp), lambda r, k: (r, 0)))
        args.append(mask)

    out_item = jnp.dtype(out_dtype).itemsize
    vmem_est = (2 * (tr * tk * jnp.dtype(adj.dtype).itemsize
                     + tk * hp * jnp.dtype(support.dtype).itemsize
                     + hp * 4
                     + (tr * hp * 4 if mask is not None else 0))
                + 2 * tr * hp * out_item
                + tr * hp * 4)                           # f32 accumulator
    cost = pl.CostEstimate(
        flops=2 * n * n * hp, transcendentals=0,
        bytes_accessed=_nbytes(adj) + grid[0] * _nbytes(support)
                        + n * hp * out_item)

    kernel = functools.partial(_agg_kernel, compute_dtype=compute_dtype,
                               relu=relu, has_mask=mask is not None)
    return pl.pallas_call(
        kernel,
        out_shape=jax.ShapeDtypeStruct((n, hp), out_dtype),
        grid=grid,
        in_specs=in_specs,
        out_specs=pl.BlockSpec((tr, hp), lambda r, k: (r, 0)),
        scratch_shapes=[pltpu.VMEM((tr, hp), jnp.float32)],
        compiler_params=_mosaic_params(vmem_est, dims=("parallel", "arbitrary")),
        cost_estimate=cost,
    )(*args)


def _dropout_scale_mask(rng_key, keep_prob, n, hp):
    keep = jax.random.bernoulli(rng_key, keep_prob, (n, hp))
    return keep.astype(jnp.float32) * (1.0 / keep_prob)


def gcn_forward(x, adj, params, dropout_p, *, training=False, rng_key=None,
                compute_dtype=jnp.bfloat16, fuse_threshold=1024,
                row_tile=256, k_tile=512, trim_output=True):
    """GCN forward: relu(adj@(x@W1)+b1) -> dropout -> adj@(h@W2)+b2."""
    w1, b1, w2, b2 = params
    n, nfeat = x.shape
    nhid = w1.shape[1]
    nout = w2.shape[1]
    fp = _round_up(nfeat, LANE)
    hp = _round_up(nhid, LANE)
    op = _round_up(nout, LANE)
    cd = compute_dtype

    # Pad feature dims (x, W, b) to 128-lane multiples: exact no-op, lane-dense
    # MXU operands and unmasked stores.  adj is passed through untouched -- no
    # wrapper-side cast/pad over the N^2 operand.
    x_p = jnp.pad(x, ((0, 0), (0, fp - nfeat))).astype(cd)
    w1_p = jnp.pad(w1, ((0, fp - nfeat), (0, hp - nhid))).astype(cd)
    b1_p = jnp.pad(b1, (0, hp - nhid)).reshape(1, hp).astype(jnp.float32)
    w2_p = jnp.pad(w2, ((0, hp - nhid), (0, op - nout))).astype(cd)
    b2_p = jnp.pad(b2, (0, op - nout)).reshape(1, op).astype(jnp.float32)

    use_dropout = bool(training) and float(dropout_p) > 0.0
    mask = None
    if use_dropout:
        if rng_key is None:
            rng_key = jax.random.PRNGKey(0)
        # NOTE: callers must vary rng_key per training step (and per shard).
        mask = _dropout_scale_mask(rng_key, 1.0 - float(dropout_p), n, hp)

    if n <= fuse_threshold:
        # ---- small-graph path: single fused launch, everything VMEM-resident.
        in_specs = [
            pl.BlockSpec(adj.shape, lambda: (0, 0)),
            pl.BlockSpec(x_p.shape, lambda: (0, 0)),
            pl.BlockSpec(w1_p.shape, lambda: (0, 0)),
            pl.BlockSpec(b1_p.shape, lambda: (0, 0)),
            pl.BlockSpec(w2_p.shape, lambda: (0, 0)),
            pl.BlockSpec(b2_p.shape, lambda: (0, 0)),
        ]
        args = [adj, x_p, w1_p, b1_p, w2_p, b2_p]
        if use_dropout:
            in_specs.append(pl.BlockSpec(mask.shape, lambda: (0, 0)))
            args.append(mask)
        in_bytes = sum(_nbytes(a) for a in args)
        out_bytes = n * op * 4
        vmem_est = 2 * (in_bytes + out_bytes) + 6 * n * hp * 4
        cost = pl.CostEstimate(
            flops=(2 * n * fp * hp + 2 * n * n * hp
                   + 2 * n * hp * op + 2 * n * n * op),
            transcendentals=0,
            bytes_accessed=in_bytes + out_bytes)
        kernel = functools.partial(_gcn_fused_kernel, compute_dtype=cd,
                                   has_mask=use_dropout)
        out_p = pl.pallas_call(
            kernel,
            out_shape=jax.ShapeDtypeStruct((n, op), jnp.float32),
            in_specs=in_specs,
            out_specs=pl.BlockSpec((n, op), lambda: (0, 0)),
            compiler_params=_mosaic_params(vmem_est),
            cost_estimate=cost,
        )(*args)
    else:
        # ---- large-graph path: row/k tiled adj streaming.  support = x @ W is
        # computed once per layer; adj (the only N^2 operand) is read exactly
        # once per layer as (tr, tk) tiles with an f32 VMEM accumulator.
        s1 = _feat_transform(x_p, w1_p, cd, row_tile)
        h = _aggregate(adj, s1, b1_p, relu=True, mask=mask, out_dtype=cd,
                       compute_dtype=cd, row_tile=row_tile, k_tile=k_tile)
        s2 = _feat_transform(h, w2_p, cd, row_tile)
        out_p = _aggregate(adj, s2, b2_p, relu=False, mask=None,
                           out_dtype=jnp.float32, compute_dtype=cd,
                           row_tile=row_tile, k_tile=k_tile)

    if trim_output:
        # At scale prefer trim_output=False and consume the lane-dense (N, op)
        # slab directly (the slice costs an extra N*op HBM pass).
        return out_p[:, :nout]
    return out_p


# --------------------------------------------------------------------------
# Reference, init, demo
# --------------------------------------------------------------------------
def gcn_reference(x, adj, params, *, mask=None):
    """Pure f32 JAX reference; `mask` is the (N, hp) dropout scale mask."""
    w1, b1, w2, b2 = params
    h = jnp.maximum(adj @ (x @ w1) + b1, 0.0)
    if mask is not None:
        h = h * mask[:, : w1.shape[1]]
    return adj @ (h @ w2) + b2


def init_gcn_params(key, nfeat, nhid, nout):
    """Kipf init: uniform(-stdv, stdv) with stdv = 1/sqrt(out_features)."""
    k1, k2, k3, k4 = jax.random.split(key, 4)
    s1 = 1.0 / jnp.sqrt(jnp.float32(nhid))
    s2 = 1.0 / jnp.sqrt(jnp.float32(nout))
    w1 = jax.random.uniform(k1, (nfeat, nhid), jnp.float32, -s1, s1)
    b1 = jax.random.uniform(k2, (nhid,), jnp.float32, -s1, s1)
    w2 = jax.random.uniform(k3, (nhid, nout), jnp.float32, -s2, s2)
    b2 = jax.random.uniform(k4, (nout,), jnp.float32, -s2, s2)
    return (w1, b1, w2, b2)


def _make_graph(key, n, nfeat):
    kx, ka = jax.random.split(key)
    x = jax.random.normal(kx, (n, nfeat), jnp.float32)
    a = (jax.random.uniform(ka, (n, n)) < 0.1).astype(jnp.float32)
    a = jnp.maximum(a, a.T) + jnp.eye(n, dtype=jnp.float32)
    adj = a / jnp.sum(a, axis=1, keepdims=True)   # row-normalized, self loops
    return x, adj


if __name__ == "__main__":
    root = jax.random.PRNGKey(0)
    kg, kp, kd, kg2 = jax.random.split(root, 4)

    N, NFEAT, NHID, NOUT = 64, 32, 32, 16
    DROPOUT = 0.5

    x, adj = _make_graph(kg, N, NFEAT)
    params = init_gcn_params(kp, NFEAT, NHID, NOUT)
    ref = gcn_reference(x, adj, params)

    # 1) eval, fused bf16-MXU path vs f32 reference (loose tol: bf16 adj).
    out = gcn_forward(x, adj, params, DROPOUT, training=False,
                      compute_dtype=jnp.bfloat16)
    jax.block_until_ready(out)
    assert out.shape == (N, NOUT)
    assert jnp.allclose(out, ref, atol=2e-2, rtol=2e-2)

    # 2) eval, fused f32 path: tight match.
    out_f32 = gcn_forward(x, adj, params, DROPOUT, training=False,
                          compute_dtype=jnp.float32)
    jax.block_until_ready(out_f32)
    assert jnp.allclose(out_f32, ref, atol=1e-4, rtol=1e-4)

    # 3) training (dropout) fused f32 path: exact mask reproduction.
    HP = _round_up(NHID, LANE)
    mask = _dropout_scale_mask(kd, 1.0 - DROPOUT, N, HP)
    out_tr = gcn_forward(x, adj, params, DROPOUT, training=True, rng_key=kd,
                         compute_dtype=jnp.float32)
    jax.block_until_ready(out_tr)
    ref_tr = gcn_reference(x, adj, params, mask=mask)
    assert jnp.allclose(out_tr, ref_tr, atol=1e-4, rtol=1e-4)

    # 3b) training fused bf16 path: smoke check.
    out_tr_bf = gcn_forward(x, adj, params, DROPOUT, training=True,
                            rng_key=kd, compute_dtype=jnp.bfloat16)
    jax.block_until_ready(out_tr_bf)
    assert out_tr_bf.shape == (N, NOUT)
    assert bool(jnp.all(jnp.isfinite(out_tr_bf)))

    # 4) tiled large-graph path (forced via fuse_threshold=0) at N=256:
    #    grid (2, 2) per aggregation kernel.
    N2 = 256
    x2, adj2 = _make_graph(kg2, N2, NFEAT)
    ref2 = gcn_reference(x2, adj2, params)
    out2_f32 = gcn_forward(x2, adj2, params, DROPOUT, training=False,
                           compute_dtype=jnp.float32, fuse_threshold=0,
                           row_tile=128, k_tile=128)
    jax.block_until_ready(out2_f32)
    assert out2_f32.shape == (N2, NOUT)
    assert jnp.allclose(out2_f32, ref2, atol=1e-4, rtol=1e-4)

    out2_bf16 = gcn_forward(x2, adj2, params, DROPOUT, training=False,
                            compute_dtype=jnp.bfloat16, fuse_threshold=0,
                            row_tile=128, k_tile=128)
    jax.block_until_ready(out2_bf16)
    assert jnp.allclose(out2_bf16, ref2, atol=3e-2, rtol=3e-2)

    print("KERNEL_OK")
</pallas_src>

<mosaic_0001>
module attributes {stable_mosaic.version = 11 : i64} {
  func.func @_gcn_fused_kernel(%arg0: memref<64x64xf32, #tpu.memory_space<vmem>>, %arg1: memref<64x128xbf16, #tpu.memory_space<vmem>>, %arg2: memref<128x128xbf16, #tpu.memory_space<vmem>>, %arg3: memref<1x128xf32, #tpu.memory_space<vmem>>, %arg4: memref<128x128xbf16, #tpu.memory_space<vmem>>, %arg5: memref<1x128xf32, #tpu.memory_space<vmem>>, %arg6: memref<64x128xf32, #tpu.memory_space<vmem>>) attributes {dimension_semantics = [], scalar_prefetch = 0 : i64, scratch_operands = 0 : i64, tpu.core_type = #tpu.core_type<tc>} {
    %c0 = arith.constant 0 : index
    %c0_0 = arith.constant 0 : index
    %0 = vector.load %arg0[%c0, %c0_0] : memref<64x64xf32, #tpu.memory_space<vmem>>, vector<64x64xf32>
    %1 = arith.truncf %0 : vector<64x64xf32> to vector<64x64xbf16>
    %c0_1 = arith.constant 0 : index
    %c0_2 = arith.constant 0 : index
    %2 = vector.load %arg1[%c0_1, %c0_2] : memref<64x128xbf16, #tpu.memory_space<vmem>>, vector<64x128xbf16>
    %c0_3 = arith.constant 0 : index
    %c0_4 = arith.constant 0 : index
    %3 = vector.load %arg2[%c0_3, %c0_4] : memref<128x128xbf16, #tpu.memory_space<vmem>>, vector<128x128xbf16>
    %cst = arith.constant dense<0.000000e+00> : vector<64x128xf32>
    %4 = tpu.matmul %2, %3, %cst {dimension_numbers = #tpu.dot_dimension_numbers<[1], [0], [0], [1], [0, 0, 1, 1], [], []>} : vector<64x128xbf16>, vector<128x128xbf16>, vector<64x128xf32> -> vector<64x128xf32>
    %5 = arith.truncf %4 : vector<64x128xf32> to vector<64x128xbf16>
    %cst_5 = arith.constant dense<0.000000e+00> : vector<64x128xf32>
    %6 = tpu.matmul %1, %5, %cst_5 {dimension_numbers = #tpu.dot_dimension_numbers<[1], [0], [0], [1], [0, 0, 1, 1], [], []>} : vector<64x64xbf16>, vector<64x128xbf16>, vector<64x128xf32> -> vector<64x128xf32>
    %c0_6 = arith.constant 0 : index
    %c0_7 = arith.constant 0 : index
    %7 = vector.load %arg3[%c0_6, %c0_7] : memref<1x128xf32, #tpu.memory_space<vmem>>, vector<1x128xf32>
    %8 = vector.broadcast %7 : vector<1x128xf32> to vector<64x128xf32>
    %9 = arith.addf %6, %8 : vector<64x128xf32>
    %cst_8 = arith.constant 0.000000e+00 : f32
    %10 = vector.broadcast %cst_8 : f32 to vector<64x128xf32>
    %11 = arith.maximumf %9, %10 : vector<64x128xf32>
    %12 = arith.truncf %11 : vector<64x128xf32> to vector<64x128xbf16>
    %c0_9 = arith.constant 0 : index
    %c0_10 = arith.constant 0 : index
    %13 = vector.load %arg4[%c0_9, %c0_10] : memref<128x128xbf16, #tpu.memory_space<vmem>>, vector<128x128xbf16>
    %cst_11 = arith.constant dense<0.000000e+00> : vector<64x128xf32>
    %14 = tpu.matmul %12, %13, %cst_11 {dimension_numbers = #tpu.dot_dimension_numbers<[1], [0], [0], [1], [0, 0, 1, 1], [], []>} : vector<64x128xbf16>, vector<128x128xbf16>, vector<64x128xf32> -> vector<64x128xf32>
    %15 = arith.truncf %14 : vector<64x128xf32> to vector<64x128xbf16>
    %cst_12 = arith.constant dense<0.000000e+00> : vector<64x128xf32>
    %16 = tpu.matmul %1, %15, %cst_12 {dimension_numbers = #tpu.dot_dimension_numbers<[1], [0], [0], [1], [0, 0, 1, 1], [], []>} : vector<64x64xbf16>, vector<64x128xbf16>, vector<64x128xf32> -> vector<64x128xf32>
    %c0_13 = arith.constant 0 : index
    %c0_14 = arith.constant 0 : index
    %17 = vector.load %arg5[%c0_13, %c0_14] : memref<1x128xf32, #tpu.memory_space<vmem>>, vector<1x128xf32>
    %18 = vector.broadcast %17 : vector<1x128xf32> to vector<64x128xf32>
    %19 = arith.addf %16, %18 : vector<64x128xf32>
    %c0_15 = arith.constant 0 : index
    %c0_16 = arith.constant 0 : index
    %20 = vector.load %arg6[%c0_15, %c0_16] : memref<64x128xf32, #tpu.memory_space<vmem>>, vector<64x128xf32>
    tpu.vector_store %arg6[%c0_15, %c0_16], %19 {strides = array<i32>} : memref<64x128xf32, #tpu.memory_space<vmem>>, vector<64x128xf32>,
    return
  }
}

</mosaic_0001>

<bundles_post_ra>
// kernel: tpu_custom_call.1
= control target key start
LH: loop header
LB: loop body
LE: loop exit
PB: predicated region body
PF: predicated region fallthrough
CT: control target
= control target key end

     0   :  { %11 = vsyncpa [#allocation3], 0  ;;  %s784_s0 = inlined_call_operand.hbm [shape: f32[64,64], index: 0, kind: input, shape index: {}]   ;;  %s785_s1 = inlined_call_operand.hbm [shape: bf16[64,128], index: 1, kind: input, shape index: {}]   ;;  %s786_s2 = inlined_call_operand.hbm [shape: bf16[128,128], index: 2, kind: input, shape index: {}]   ;;  %s787_s3 = inlined_call_operand.vmem [shape: f32[1,128], index: 3, kind: input, shape index: {}]   ;;  %s788_s4 = inlined_call_operand.hbm [shape: bf16[128,128], index: 4, kind: input, shape index: {}]   ;;  %s789_s5 = inlined_call_operand.vmem [shape: f32[1,128], index: 5, kind: input, shape index: {}]   ;;  %s790_s6 = inlined_call_operand.hbm [shape: f32[64,128], index: 6, kind: output, shape index: {}]  }
   0x1   :  { %12 = vsyncpa [#allocation6], 0 }
   0x2   :  { %13 = vsyncpa [#allocation9], 0  ;;  %s32_s23 = sshll.u32 %s785_s1, 4  ;;  %s33_s23 = int_to_ptr.hbm [resolvable:$true] %s32_s23 }
   0x3   :  { %14 = vsyncpa [#allocation4], 0  ;;  %s693_s24 = smov [#allocation5]   ;;  %s19_s28 = sshll.u32 %s784_s0, 4  ;;  %s20_s28 = int_to_ptr.hbm [resolvable:$true] %s19_s28 }
   0x4   :  { %s34_s25 = sshll.u32 %s693_s24, 4  ;;  %s694_s29 = smov 64   ;;  %s35_s25 = int_to_ptr.vmem [resolvable:$true] %s34_s25 }
   0x5   :  { %s695_s30 = smov 4   ;;  %s696_s7 = smov [#allocation2]  }
   0x6   :  { %40 = dma.hbm_to_vmem [thread:$0]  %s33_s23, 512, %s35_s25, [#allocation6], %s694_s29, %s694_s29, %s695_s30  }
   0x7   :  { %s21_s8 = sshll.u32 %s696_s7, 4  ;;  %s697_s9 = smov 128   ;;  %s22_s8 = int_to_ptr.vmem [resolvable:$true] %s21_s8 }
   0x8   :  { %s698_s10 = smov 8   ;;  %s45_s12 = sshll.u32 %s786_s2, 4  ;;  %s46_s12 = int_to_ptr.hbm [resolvable:$true] %s45_s12 }
   0x9   :  { %27 = dma.hbm_to_vmem [thread:$0]  %s20_s28, 1024, %s22_s8, [#allocation3], %s697_s9, %s697_s9, %s698_s10  }
   0xa   :  { %s699_s13 = smov [#allocation7]   ;;  %s60_s16 = sshll.u32 %s788_s4, 4  ;;  %s61_s16 = int_to_ptr.hbm [resolvable:$true] %s60_s16 }
   0xb   :  { %s47_s0 = sshll.u32 %s699_s13, 4  ;;  %s700_s17 = smov [#allocation8]   ;;  %s48_s0 = int_to_ptr.vmem [resolvable:$true] %s47_s0 }
   0xc   :  { %53 = dma.hbm_to_vmem [thread:$0]  %s46_s12, 1024, %s48_s0, [#allocation6], %s694_s29, %s694_s29, %s695_s30  }
   0xd   :  { %s62_s18 = sshll.u32 %s700_s17, 4  ;;  %s63_s18 = int_to_ptr.vmem [resolvable:$true] %s62_s18 }
   0xe   :  { %68 = dma.hbm_to_vmem [thread:$0]  %s61_s16, 1024, %s63_s18, [#allocation9], %s694_s29, %s694_s29, %s695_s30  }
   0xf   :  { %685 = dma.done.wait [#allocation3], 1024  }
  0x10   :  { %686 = vsyncadd [#allocation3], 4294966272 }
  0x11   :  { %687 = dma.done.wait [#allocation6], 1536  }
  0x12   :  { %688 = vsyncadd [#allocation6], 4294965760 }
  0x13   :  { %689 = dma.done.wait [#allocation9], 1024  }
  0x14   :  { %690 = vsyncadd [#allocation9], 4294966272  ;;  %v545_v0 = vld [vmem:[#allocation7 + $0x38] sm:$0xff]  ;;  %v544_v1 = vld [vmem:[#allocation7 + $0x30] sm:$0xff]  ;;  %vm233_vm0 = vcmask 523264   ;;  %s431_s23 = sshll.u32 %s790_s6, 4  ;;  %s432_s23 = int_to_ptr.hbm [resolvable:$true] %s431_s23 }
  0x15   :  { %196 = vmatpush.bf16.msra.mxu0 %v545_v0  ;;  %v543_v2 = vld [vmem:[#allocation7 + $0x28] sm:$0xff]  ;;  %v542_v3 = vld [vmem:[#allocation7 + $0x20] sm:$0xff]  ;;  %v541_v4 = vld [vmem:[#allocation7 + $0x18] sm:$0xff] }
  0x16   :  { %v540_v5 = vld [vmem:[#allocation7 + $0x10] sm:$0xff]  ;;  %v539_v6 = vld [vmem:[#allocation7 + $0x8] sm:$0xff]  ;;  %v538_v7 = vld [vmem:[#allocation7] sm:$0xff] }
  0x17   :  { %v534_v8 = vld [vmem:[#allocation5] sm:$0xff]  ;;  %v535_v9 = vld [vmem:[#allocation5 + $0x8] sm:$0xff]  ;;  %v536_v10 = vld [vmem:[#allocation5 + $0x10] sm:$0xff] }
  0x18   :  { %v537_v11 = vld [vmem:[#allocation5 + $0x18] sm:$0xff]  ;;  %v88_v23 = vld [vmem:[#allocation2] sm:$0xff]  ;;  %v89_v24 = vld [vmem:[#allocation2 + $0x8] sm:$0xff] }
  0x19   :  { %197 = vmatpush.bf16.msra.mxu0 %v544_v1  ;;  %v752_v26 = vpack.c.bf16 %v89_v24, %v88_v23  ;;  %v90_v27 = vld [vmem:[#allocation2 + $0x10] sm:$0xff]  ;;  %v91_v28 = vld [vmem:[#allocation2 + $0x18] sm:$0xff]  ;;  %v551_v32 = vld [vmem:[#allocation8 + $0x28] sm:$0xff] }
  0x1a   :  { %v756_v29 = vpack.c.bf16 %v91_v28, %v90_v27  ;;  %v553_v30 = vld [vmem:[#allocation8 + $0x38] sm:$0xff]  ;;  %v552_v31 = vld [vmem:[#allocation8 + $0x30] sm:$0xff]  ;;  %v92_v33 = vld [vmem:[#allocation2 + $0x20] sm:$0xff] }
  0x1b   :  { %351 = vmatpush.bf16.msra.mxu2 %v553_v30  ;;  %v93_v34 = vld [vmem:[#allocation2 + $0x28] sm:$0xff]  ;;  %v550_v35 = vld [vmem:[#allocation8 + $0x20] sm:$0xff]  ;;  %v94_v37 = vld [vmem:[#allocation2 + $0x30] sm:$0xff] }
  0x1c   :  { %v760_v36 = vpack.c.bf16 %v93_v34, %v92_v33  ;;  %v95_v38 = vld [vmem:[#allocation2 + $0x38] sm:$0xff]  ;;  %v548_v41 = vld [vmem:[#allocation8 + $0x10] sm:$0xff]  ;;  %v547_v42 = vld [vmem:[#allocation8 + $0x8] sm:$0xff] }
  0x1d   :  { %198 = vmatpush.bf16.msra.mxu0 %v543_v2  ;;  %v99_v39 = vpack.c.bf16 %v95_v38, %v94_v37  ;;  %v549_v40 = vld [vmem:[#allocation8 + $0x18] sm:$0xff]  ;;  %v546_v43 = vld [vmem:[#allocation8] sm:$0xff] }
  0x1e   :  { %v563_v45 = vld [vmem:[%s787_s3] ss:$0 sm:$0xff] }
  0x1f   :  { %352 = vmatpush.bf16.msra.mxu2 %v552_v31 }
  0x21   :  { %199 = vmatpush.bf16.msra.mxu0 %v542_v3 }
  0x23   :  { %353 = vmatpush.bf16.msra.mxu2 %v551_v32 }
  0x25   :  { %200 = vmatpush.bf16.msra.mxu0 %v541_v4 }
  0x27   :  { %354 = vmatpush.bf16.msra.mxu2 %v550_v35 }
  0x29   :  { %201 = vmatpush.bf16.msra.mxu0 %v540_v5 }
  0x2b   :  { %355 = vmatpush.bf16.msra.mxu2 %v549_v40 }
  0x2d   :  { %202 = vmatpush.bf16.msra.mxu0 %v539_v6 }
  0x2f   :  { %356 = vmatpush.bf16.msra.mxu2 %v548_v41 }
  0x31   :  { %203 = vmatpush.bf16.msra.mxu0 %v538_v7 }
  0x33   :  { %357 = vmatpush.bf16.msra.mxu2 %v547_v42 }
  0x34   :  { %204 = vmatmul.bf16.vlgmr.msra.gmra.mxu0 %v534_v8 }
  0x37   :  { %358 = vmatpush.bf16.msra.mxu2 %v546_v43 }
  0x44   :  { %209 = vmatmul.bf16.gmra.mxu0 %v535_v9 }
  0x54   :  { %214 = vmatmul.bf16.gmra.mxu0 %v536_v10 }
  0x64   :  { %219 = vmatmul.bf16.gmra.mxu0 %v537_v11 }
  0xb1   :  { %v205_v12 = vpop.f32.mrf.mxu0 }
  0xb9   :  { %v207_v13 = vpop.f32.mrf.mxu0 }
  0xba   :  { %v225_v25 = vpack.c.bf16 %v207_v13, %v205_v12 }
  0xc1   :  { %v210_v14 = vpop.f32.mrf.mxu0 }
  0xc9   :  { %v212_v15 = vpop.f32.mrf.mxu0 }
  0xca   :  { %v226_v22 = vpack.c.bf16 %v212_v15, %v210_v14 }
  0xd1   :  { %v215_v16 = vpop.f32.mrf.mxu0 }
  0xd9   :  { %v217_v17 = vpop.f32.mrf.mxu0 }
  0xda   :  { %v227_v21 = vpack.c.bf16 %v217_v17, %v215_v16 }
  0xe1   :  { %v220_v18 = vpop.f32.mrf.mxu0 }
  0xe9   :  { %v222_v19 = vpop.f32.mrf.mxu0 }
  0xea   :  { %v228_v20 = vpack.c.bf16 %v222_v19, %v220_v18 }
  0xec   :  { %250 = vmatpush.bf16.msra.mxu1 %v228_v20 }
  0xf0   :  { %251 = vmatpush.bf16.msra.mxu1 %v227_v21  ;;  %v564_v21 = vld [vmem:[%s789_s5] ss:$0 sm:$0xff]  ;;  %s701_s5 = smov [#allocation10]  }
  0xf1   :  { %s429_s20 = sshll.u32 %s701_s5, 4  ;;  %s430_s20 = int_to_ptr.vmem [resolvable:$true] %s429_s20 }
  0xf4   :  { %252 = vmatpush.bf16.msra.mxu1 %v226_v22 }
  0xf8   :  { %253 = vmatpush.bf16.msra.mxu1 %v225_v25 }
  0xfb   :  { %494 = vmatmul.msk.bf16.vlgmr.msra.gmra.mxu1 %vm233_vm0, %v752_v26 }
 0x10b   :  { %495 = vmatmul.msk.bf16.gmra.mxu1 %vm233_vm0, %v756_v29 }
 0x11b   :  { %496 = vmatmul.msk.bf16.gmra.mxu1 %vm233_vm0, %v760_v36 }
 0x12b   :  { %497 = vmatmul.msk.bf16.gmra.mxu1 %vm233_vm0, %v99_v39 }
 0x178   :  { %v255_v44 = vpop.f32.mrf.mxu1 }
 0x179   :  { %v256_v46 = vadd.f32 %v563_v45, %v255_v44 }
 0x17b   :  { %v275_v49 = vmax.f32 %v256_v46, 0.0 }
 0x180   :  { %v257_v47 = vpop.f32.mrf.mxu1 }
 0x181   :  { %v258_v48 = vadd.f32 %v563_v45, %v257_v47 }
 0x183   :  { %v276_v50 = vmax.f32 %v258_v48, 0.0 }
 0x185   :  { %v283_v51 = vpack.c.bf16 %v276_v50, %v275_v49 }
 0x187   :  { %359 = vmatmul.bf16.vlgmr.msra.gmra.mxu2 %v283_v51 }
 0x188   :  { %v260_v52 = vpop.f32.mrf.mxu1 }
 0x189   :  { %v261_v53 = vadd.f32 %v563_v45, %v260_v52 }
 0x18b   :  { %v277_v56 = vmax.f32 %v261_v53, 0.0 }
 0x190   :  { %v262_v54 = vpop.f32.mrf.mxu1 }
 0x191   :  { %v263_v55 = vadd.f32 %v563_v45, %v262_v54 }
 0x193   :  { %v278_v57 = vmax.f32 %v263_v55, 0.0 }
 0x195   :  { %v284_v58 = vpack.c.bf16 %v278_v57, %v277_v56 }
 0x197   :  { %364 = vmatmul.bf16.gmra.mxu2 %v284_v58 }
 0x198   :  { %v265_v59 = vpop.f32.mrf.mxu1 }
 0x199   :  { %v266_v60 = vadd.f32 %v563_v45, %v265_v59 }
 0x19b   :  { %v279_v63 = vmax.f32 %v266_v60, 0.0 }
 0x1a0   :  { %v267_v61 = vpop.f32.mrf.mxu1 }
 0x1a1   :  { %v268_v62 = vadd.f32 %v563_v45, %v267_v61 }
 0x1a3   :  { %v280_v0 = vmax.f32 %v268_v62, 0.0 }
 0x1a5   :  { %v285_v1 = vpack.c.bf16 %v280_v0, %v279_v63 }
 0x1a7   :  { %369 = vmatmul.bf16.gmra.mxu2 %v285_v1 }
 0x1a8   :  { %v270_v2 = vpop.f32.mrf.mxu1 }
 0x1a9   :  { %v271_v3 = vadd.f32 %v563_v45, %v270_v2 }
 0x1ab   :  { %v281_v6 = vmax.f32 %v271_v3, 0.0 }
 0x1b0   :  { %v272_v4 = vpop.f32.mrf.mxu1 }
 0x1b1   :  { %v273_v5 = vadd.f32 %v563_v45, %v272_v4 }
 0x1b3   :  { %v282_v7 = vmax.f32 %v273_v5, 0.0 }
 0x1b5   :  { %v286_v8 = vpack.c.bf16 %v282_v7, %v281_v6 }
 0x1b7   :  { %374 = vmatmul.bf16.gmra.mxu2 %v286_v8 }
 0x20a   :  { %v360_v9 = vpop.f32.mrf.mxu2 }
 0x212   :  { %v362_v10 = vpop.f32.mrf.mxu2 }
 0x213   :  { %v380_v20 = vpack.c.bf16 %v362_v10, %v360_v9 }
 0x21a   :  { %v365_v11 = vpop.f32.mrf.mxu2 }
 0x222   :  { %v367_v12 = vpop.f32.mrf.mxu2 }
 0x223   :  { %v381_v19 = vpack.c.bf16 %v367_v12, %v365_v11 }
 0x22a   :  { %v370_v13 = vpop.f32.mrf.mxu2 }
 0x232   :  { %v372_v14 = vpop.f32.mrf.mxu2 }
 0x233   :  { %v382_v18 = vpack.c.bf16 %v372_v14, %v370_v13 }
 0x23a   :  { %v375_v15 = vpop.f32.mrf.mxu2 }
 0x242   :  { %v377_v16 = vpop.f32.mrf.mxu2 }
 0x243   :  { %v383_v17 = vpack.c.bf16 %v377_v16, %v375_v15 }
 0x245   :  { %392 = vmatpush.bf16.msra.mxu3 %v383_v17 }
 0x249   :  { %393 = vmatpush.bf16.msra.mxu3 %v382_v18 }
 0x24d   :  { %394 = vmatpush.bf16.msra.mxu3 %v381_v19 }
 0x251   :  { %395 = vmatpush.bf16.msra.mxu3 %v380_v20 }
 0x254   :  { %530 = vmatmul.msk.bf16.vlgmr.msra.gmra.mxu3 %vm233_vm0, %v752_v26 }
 0x264   :  { %531 = vmatmul.msk.bf16.gmra.mxu3 %vm233_vm0, %v756_v29 }
 0x274   :  { %532 = vmatmul.msk.bf16.gmra.mxu3 %vm233_vm0, %v760_v36 }
 0x284   :  { %533 = vmatmul.msk.bf16.gmra.mxu3 %vm233_vm0, %v99_v39 }
 0x2d7   :  { %v397_v22 = vpop.f32.mrf.mxu3 }
 0x2d8   :  { %v398_v23 = vadd.f32 %v564_v21, %v397_v22 }
 0x2da   :  { %417 = vst [vmem:[#allocation10] sm:$0xff] %v398_v23 }
 0x2df   :  { %v399_v24 = vpop.f32.mrf.mxu3 }
 0x2e0   :  { %v400_v25 = vadd.f32 %v564_v21, %v399_v24 }
 0x2e2   :  { %418 = vst [vmem:[#allocation10 + $0x8] sm:$0xff] %v400_v25 }
 0x2e7   :  { %v402_v27 = vpop.f32.mrf.mxu3 }
 0x2e8   :  { %v403_v26 = vadd.f32 %v564_v21, %v402_v27 }
 0x2ea   :  { %419 = vst [vmem:[#allocation10 + $0x10] sm:$0xff] %v403_v26 }
 0x2ef   :  { %v404_v28 = vpop.f32.mrf.mxu3 }
 0x2f0   :  { %v405_v29 = vadd.f32 %v564_v21, %v404_v28 }
 0x2f2   :  { %420 = vst [vmem:[#allocation10 + $0x18] sm:$0xff] %v405_v29 }
 0x2f7   :  { %v407_v30 = vpop.f32.mrf.mxu3 }
 0x2f8   :  { %v408_v31 = vadd.f32 %v564_v21, %v407_v30 }
 0x2fa   :  { %421 = vst [vmem:[#allocation10 + $0x20] sm:$0xff] %v408_v31 }
 0x2ff   :  { %v409_v32 = vpop.f32.mrf.mxu3 }
 0x300   :  { %v410_v33 = vadd.f32 %v564_v21, %v409_v32 }
 0x302   :  { %422 = vst [vmem:[#allocation10 + $0x28] sm:$0xff] %v410_v33 }
 0x307   :  { %v412_v34 = vpop.f32.mrf.mxu3 }
 0x308   :  { %v413_v35 = vadd.f32 %v564_v21, %v412_v34 }
 0x30a   :  { %423 = vst [vmem:[#allocation10 + $0x30] sm:$0xff] %v413_v35 }
 0x30f   :  { %v414_v36 = vpop.f32.mrf.mxu3 }
 0x310   :  { %v415_v37 = vadd.f32 %v564_v21, %v414_v36 }
 0x312   :  { %424 = vst [vmem:[#allocation10 + $0x38] sm:$0xff] %v415_v37 }
 0x313   :  { %437 = dma.vmem_to_hbm [thread:$0]  %s430_s20, 1024, %s432_s23, [#allocation4], %s697_s9, %s697_s9, %s698_s10  }
 0x314   :  { %691 = dma.done.wait [#allocation4], 1024  }
 0x315   :  { %692 = vsyncadd [#allocation4], 4294966272 }
 0x316   :  { %442 = vsyncpa [#allocation3], 1 }
 0x317   :  { %443 = vsyncpa [#allocation6], 1 }
 0x318   :  { %444 = vsyncpa [#allocation9], 1 }
 0x319   :  { %445 = vsyncpa [#allocation4], 1 }

</bundles_post_ra>
